<compile_context>
chip_gen: v7x
topology: tpu7x:2x2x1
jax: 0.10.0
libtpu: 0.0.40
codegen_flags: <defaults>
</compile_context>

<pallas_src>
import math

import jax
import jax.numpy as jnp
from jax.experimental import pallas as pl
from jax.experimental.pallas import tpu as pltpu


def _round_up(x: int, m: int) -> int:
    return (x + m - 1) // m * m


def _make_ntxent_kernel(*, temperature, B, TR, half, ncb, corr,
                        use_bf16_matmul):
    inv_t = 1.0 / temperature

    def l2norm(x):
        # F.normalize(p=2, dim=1): x / max(||x||_2, eps), eps = 1e-12
        nrm = jnp.sqrt(jnp.sum(x * x, axis=1, keepdims=True))
        return x / jnp.maximum(nrm, 1e-12)

    def kernel(row_ref, partner_ref, col_ref, out_ref, denom_acc, row_cache):
        # program_id read at kernel top level only (never inside pl.when).
        i = pl.program_id(0)
        j = pl.program_id(1)

        @pl.when(j == 0)
        def _():
            denom_acc[...] = jnp.zeros_like(denom_acc)
            # normalize the (resident) row block once per row sweep.
            row_cache[...] = l2norm(row_ref[...].astype(jnp.float32))

        row_n = row_cache[...]                               # (TR, Dp) f32
        col_n = l2norm(col_ref[...].astype(jnp.float32))     # (TC, Dp) f32

        if use_bf16_matmul:
            row_mm = row_n.astype(jnp.bfloat16)
            col_mm = col_n.astype(jnp.bfloat16)
        else:
            row_mm, col_mm = row_n, col_n

        # sim tile = rows @ cols.T without materializing a transpose:
        # contract the lane (feature) dim of both operands on the MXU.
        sim = jax.lax.dot_general(
            row_mm, col_mm,
            dimension_numbers=(((1,), (1,)), ((), ())),
            preferred_element_type=jnp.float32)              # (TR, TC)

        denom_acc[...] += jnp.sum(jnp.exp(sim * inv_t), axis=1, keepdims=True)

        @pl.when(j == ncb - 1)
        def _():
            # positive pairs: rowwise dot with the partner half (no N^2 mask)
            partner_n = l2norm(partner_ref[...].astype(jnp.float32))
            pos = jnp.sum(row_n * partner_n, axis=1, keepdims=True)   # (TR,1)

            # full row sum of exp(sim/t), arithmetically corrected for:
            #  (a) the diagonal (sim=1, masked to 0 -> exp(0)=1 in the ref)
            #  (b) zero-padded columns (each contributes exp(0)=1)
            denom = denom_acc[...] + corr

            # loss = -log(exp(pos/t)/denom) = log(denom) - pos/t
            loss_rows = jnp.log(denom) - pos * inv_t                  # (TR,1)

            # mask pure batch-padding rows; reduce to a per-block partial.
            local = jax.lax.broadcasted_iota(jnp.int32, (TR, 1), 0)
            row_in_half = (i % half) * TR + local
            valid = row_in_half < B
            partial = jnp.sum(jnp.where(valid, loss_rows, 0.0))

            # lane-dense (8,128) output block: avoids masked 1-lane stores.
            out_ref[...] = jnp.full((1, 8, 128), partial, dtype=jnp.float32)

    return kernel


def ntxent_loss(z_i, z_j, temperature: float = 0.5, *, row_tile: int = 256,
                col_tile: int = 512, use_bf16_matmul: bool = False,
                vmem_limit_bytes: int = 32 * 1024 * 1024):
    B, D = z_i.shape
    assert z_j.shape == (B, D)

    # ---- padding / tiling (zero padding changes neither norms nor dots) ----
    D_pad = _round_up(D, 128)
    TR = row_tile if B >= row_tile else _round_up(B, 8)
    B_pad = _round_up(B, TR)
    N, N_pad = 2 * B, 2 * B_pad
    TC = col_tile if N_pad % col_tile == 0 else N_pad
    nrb = N_pad // TR          # number of row blocks
    ncb = N_pad // TC          # number of column (reduction) blocks
    half = B_pad // TR         # row-block offset of the partner half

    zi = jnp.pad(z_i.astype(jnp.float32), ((0, B_pad - B), (0, D_pad - D)))
    zj = jnp.pad(z_j.astype(jnp.float32), ((0, B_pad - B), (0, D_pad - D)))
    reps = jnp.concatenate([zi, zj], axis=0)       # (N_pad, D_pad)

    # +1 - exp(1/t) (diagonal) and -(N_pad - N) (zero-padded columns)
    corr = 1.0 - math.exp(1.0 / temperature) - float(N_pad - N)

    kernel = _make_ntxent_kernel(temperature=temperature, B=B, TR=TR,
                                 half=half, ncb=ncb, corr=corr,
                                 use_bf16_matmul=use_bf16_matmul)

    partials = pl.pallas_call(
        kernel,
        out_shape=jax.ShapeDtypeStruct((nrb, 8, 128), jnp.float32),
        grid_spec=pltpu.PrefetchScalarGridSpec(
            num_scalar_prefetch=0,
            grid=(nrb, ncb),
            in_specs=[
                # row block (revisited across j -> fetched once per row block)
                pl.BlockSpec((TR, D_pad), lambda i, j: (i, 0)),
                # partner row block from the other half of reps
                pl.BlockSpec((TR, D_pad), lambda i, j: ((i + half) % nrb, 0)),
                # streaming column block (reduction axis)
                pl.BlockSpec((TC, D_pad), lambda i, j: (j, 0)),
            ],
            out_specs=pl.BlockSpec((1, 8, 128), lambda i, j: (i, 0, 0)),
            scratch_shapes=[
                pltpu.VMEM((TR, 1), jnp.float32),       # denom accumulator
                pltpu.VMEM((TR, D_pad), jnp.float32),   # cached normalized rows
            ],
        ),
        compiler_params=pltpu.CompilerParams(
            dimension_semantics=("parallel", "arbitrary"),
            vmem_limit_bytes=vmem_limit_bytes),
    )(reps, reps, reps)

    # finish the mean outside the kernel (sum of per-row-block partials).
    return jnp.sum(partials[:, 0, 0]) / N


def _ntxent_ref(z_i, z_j, temperature=0.5):
    # Pure-JAX reference mirroring the PyTorch module, for sanity checking.
    def l2norm(x):
        n = jnp.sqrt(jnp.sum(x * x, axis=1, keepdims=True))
        return x / jnp.maximum(n, 1e-12)

    zi = l2norm(z_i.astype(jnp.float32))
    zj = l2norm(z_j.astype(jnp.float32))
    reps = jnp.concatenate([zi, zj], axis=0)
    sim = reps @ reps.T
    B = z_i.shape[0]
    N = 2 * B
    mask = jnp.logical_not(jnp.eye(N, dtype=bool))
    pos = jnp.concatenate(
        [jnp.diagonal(sim, offset=B), jnp.diagonal(sim, offset=-B)], axis=0)
    neg = sim * mask
    num = jnp.exp(pos / temperature)
    den = jnp.sum(jnp.exp(neg / temperature), axis=1)
    return jnp.mean(-jnp.log(num / den))


if __name__ == "__main__":
    key = jax.random.PRNGKey(0)
    k1, k2, k3, k4 = jax.random.split(key, 4)

    # small case matching the module's typical projection-head shapes
    B, D = 4, 32
    z_i = jax.random.normal(k1, (B, D), dtype=jnp.float32)
    z_j = jax.random.normal(k2, (B, D), dtype=jnp.float32)

    loss = ntxent_loss(z_i, z_j, temperature=0.5)
    jax.block_until_ready(loss)
    ref = _ntxent_ref(z_i, z_j, temperature=0.5)
    assert jnp.allclose(loss, ref, atol=1e-5, rtol=1e-5), (loss, ref)

    # exercise multi row/col blocks + batch/feature padding + row masking
    B2, D2 = 100, 48
    z_i2 = jax.random.normal(k3, (B2, D2), dtype=jnp.float32)
    z_j2 = jax.random.normal(k4, (B2, D2), dtype=jnp.float32)

    loss2 = ntxent_loss(z_i2, z_j2, temperature=0.5, row_tile=64, col_tile=128)
    jax.block_until_ready(loss2)
    ref2 = _ntxent_ref(z_i2, z_j2, temperature=0.5)
    assert jnp.allclose(loss2, ref2, atol=1e-5, rtol=1e-5), (loss2, ref2)

    print("KERNEL_OK")
</pallas_src>

<mosaic_0001>
module attributes {stable_mosaic.version = 11 : i64} {
  func.func @kernel(%arg0: i32, %arg1: i32, %arg2: memref<8x128xf32, #tpu.memory_space<vmem>>, %arg3: memref<8x128xf32, #tpu.memory_space<vmem>>, %arg4: memref<16x128xf32, #tpu.memory_space<vmem>>, %arg5: memref<1x8x128xf32, #tpu.memory_space<vmem>>, %arg6: memref<8x1xf32, #tpu.memory_space<vmem>>, %arg7: memref<8x128xf32, #tpu.memory_space<vmem>>) attributes {dimension_semantics = [#tpu.dimension_semantics<parallel>, #tpu.dimension_semantics<arbitrary>], iteration_bounds = array<i64: 2, 1>, scalar_prefetch = 0 : i64, scratch_operands = 2 : i64, tpu.core_type = #tpu.core_type<tc>, window_params = [{transform_indices = @transform_0, window_bounds = array<i64: 8, 128>}, {transform_indices = @transform_1, window_bounds = array<i64: 8, 128>}, {transform_indices = @transform_2, window_bounds = array<i64: 16, 128>}, {transform_indices = @transform_3, window_bounds = array<i64: 1, 8, 128>}]} {
    %c0_i32 = arith.constant 0 : i32
    %0 = arith.cmpi eq, %arg1, %c0_i32 : i32
    %1 = arith.extui %0 : i1 to i32
    %c0_i32_0 = arith.constant 0 : i32
    %2 = arith.cmpi ne, %1, %c0_i32_0 : i32
    scf.if %2 {
      %cst_14 = arith.constant 0.000000e+00 : f32
      %25 = vector.broadcast %cst_14 : f32 to vector<8x1xf32>
      %c0_15 = arith.constant 0 : index
      %c0_16 = arith.constant 0 : index
      %26 = vector.load %arg6[%c0_15, %c0_16] : memref<8x1xf32, #tpu.memory_space<vmem>>, vector<8x1xf32>
      tpu.vector_store %arg6[%c0_15, %c0_16], %25 {strides = array<i32>} : memref<8x1xf32, #tpu.memory_space<vmem>>, vector<8x1xf32>,
      %c0_17 = arith.constant 0 : index
      %c0_18 = arith.constant 0 : index
      %27 = vector.load %arg2[%c0_17, %c0_18] : memref<8x128xf32, #tpu.memory_space<vmem>>, vector<8x128xf32>
      %28 = arith.mulf %27, %27 : vector<8x128xf32>
      %cst_19 = arith.constant dense<0.000000e+00> : vector<8xf32>
      %29 = vector.multi_reduction <add>, %28, %cst_19 [1] : vector<8x128xf32> to vector<8xf32>
      %30 = vector.shape_cast %29 : vector<8xf32> to vector<8x1xf32>
      %31 = math.sqrt %30 : vector<8x1xf32>
      %cst_20 = arith.constant 9.99999996E-13 : f32
      %32 = vector.broadcast %cst_20 : f32 to vector<8x1xf32>
      %33 = arith.maximumf %31, %32 : vector<8x1xf32>
      %34 = vector.broadcast %33 : vector<8x1xf32> to vector<8x128xf32>
      %35 = arith.divf %27, %34 : vector<8x128xf32>
      %c0_21 = arith.constant 0 : index
      %c0_22 = arith.constant 0 : index
      %36 = vector.load %arg7[%c0_21, %c0_22] : memref<8x128xf32, #tpu.memory_space<vmem>>, vector<8x128xf32>
      tpu.vector_store %arg7[%c0_21, %c0_22], %35 {strides = array<i32>} : memref<8x128xf32, #tpu.memory_space<vmem>>, vector<8x128xf32>,
    } else {
    }
    %c0 = arith.constant 0 : index
    %c0_1 = arith.constant 0 : index
    %3 = vector.load %arg7[%c0, %c0_1] : memref<8x128xf32, #tpu.memory_space<vmem>>, vector<8x128xf32>
    %c0_2 = arith.constant 0 : index
    %c0_3 = arith.constant 0 : index
    %4 = vector.load %arg4[%c0_2, %c0_3] : memref<16x128xf32, #tpu.memory_space<vmem>>, vector<16x128xf32>
    %5 = arith.mulf %4, %4 : vector<16x128xf32>
    %cst = arith.constant dense<0.000000e+00> : vector<16xf32>
    %6 = vector.multi_reduction <add>, %5, %cst [1] : vector<16x128xf32> to vector<16xf32>
    %7 = vector.shape_cast %6 : vector<16xf32> to vector<16x1xf32>
    %8 = math.sqrt %7 : vector<16x1xf32>
    %cst_4 = arith.constant 9.99999996E-13 : f32
    %9 = vector.broadcast %cst_4 : f32 to vector<16x1xf32>
    %10 = arith.maximumf %8, %9 : vector<16x1xf32>
    %11 = vector.broadcast %10 : vector<16x1xf32> to vector<16x128xf32>
    %12 = arith.divf %4, %11 : vector<16x128xf32>
    %cst_5 = arith.constant dense<0.000000e+00> : vector<8x16xf32>
    %13 = tpu.matmul %3, %12, %cst_5 {dimension_numbers = #tpu.dot_dimension_numbers<[1], [1], [0], [0], [0, 0, 1, 0], [], []>} : vector<8x128xf32>, vector<16x128xf32>, vector<8x16xf32> -> vector<8x16xf32>
    %c0_6 = arith.constant 0 : index
    %c0_7 = arith.constant 0 : index
    %14 = vector.load %arg6[%c0_6, %c0_7] : memref<8x1xf32, #tpu.memory_space<vmem>>, vector<8x1xf32>
    %cst_8 = arith.constant 2.000000e+00 : f32
    %15 = vector.broadcast %cst_8 : f32 to vector<8x16xf32>
    %16 = arith.mulf %13, %15 : vector<8x16xf32>
    %17 = math.exp %16 : vector<8x16xf32>
    %cst_9 = arith.constant dense<0.000000e+00> : vector<8xf32>
    %18 = vector.multi_reduction <add>, %17, %cst_9 [1] : vector<8x16xf32> to vector<8xf32>
    %19 = vector.shape_cast %18 : vector<8xf32> to vector<8x1xf32>
    %20 = arith.addf %14, %19 : vector<8x1xf32>
    %c0_10 = arith.constant 0 : index
    %c0_11 = arith.constant 0 : index
    %21 = vector.load %arg6[%c0_10, %c0_11] : memref<8x1xf32, #tpu.memory_space<vmem>>, vector<8x1xf32>
    tpu.vector_store %arg6[%c0_10, %c0_11], %20 {strides = array<i32>} : memref<8x1xf32, #tpu.memory_space<vmem>>, vector<8x1xf32>,
    %c0_i32_12 = arith.constant 0 : i32
    %22 = arith.cmpi eq, %arg1, %c0_i32_12 : i32
    %23 = arith.extui %22 : i1 to i32
    %c0_i32_13 = arith.constant 0 : i32
    %24 = arith.cmpi ne, %23, %c0_i32_13 : i32
    scf.if %24 {
      %c0_14 = arith.constant 0 : index
      %c0_15 = arith.constant 0 : index
      %25 = vector.load %arg3[%c0_14, %c0_15] : memref<8x128xf32, #tpu.memory_space<vmem>>, vector<8x128xf32>
      %26 = arith.mulf %25, %25 : vector<8x128xf32>
      %cst_16 = arith.constant dense<0.000000e+00> : vector<8xf32>
      %27 = vector.multi_reduction <add>, %26, %cst_16 [1] : vector<8x128xf32> to vector<8xf32>
      %28 = vector.shape_cast %27 : vector<8xf32> to vector<8x1xf32>
      %29 = math.sqrt %28 : vector<8x1xf32>
      %cst_17 = arith.constant 9.99999996E-13 : f32
      %30 = vector.broadcast %cst_17 : f32 to vector<8x1xf32>
      %31 = arith.maximumf %29, %30 : vector<8x1xf32>
      %32 = vector.broadcast %31 : vector<8x1xf32> to vector<8x128xf32>
      %33 = arith.divf %25, %32 : vector<8x128xf32>
      %34 = arith.mulf %3, %33 : vector<8x128xf32>
      %cst_18 = arith.constant dense<0.000000e+00> : vector<8xf32>
      %35 = vector.multi_reduction <add>, %34, %cst_18 [1] : vector<8x128xf32> to vector<8xf32>
      %36 = vector.shape_cast %35 : vector<8xf32> to vector<8x1xf32>
      %c0_19 = arith.constant 0 : index
      %c0_20 = arith.constant 0 : index
      %37 = vector.load %arg6[%c0_19, %c0_20] : memref<8x1xf32, #tpu.memory_space<vmem>>, vector<8x1xf32>
      %cst_21 = arith.constant -14.3890562 : f32
      %38 = vector.broadcast %cst_21 : f32 to vector<8x1xf32>
      %39 = arith.addf %37, %38 : vector<8x1xf32>
      %40 = math.log %39 : vector<8x1xf32>
      %cst_22 = arith.constant 2.000000e+00 : f32
      %41 = vector.broadcast %cst_22 : f32 to vector<8x1xf32>
      %42 = arith.mulf %36, %41 : vector<8x1xf32>
      %43 = arith.subf %40, %42 : vector<8x1xf32>
      %44 = tpu.iota {dimensions = array<i32: 0>} : vector<8x1xi32>
      %c1_i32 = arith.constant 1 : i32
      %c0_i32_23 = arith.constant 0 : i32
      %45 = arith.cmpi eq, %c1_i32, %c0_i32_23 : i32
      %c1_i32_24 = arith.constant 1 : i32
      %46 = arith.select %45, %c1_i32_24, %c1_i32 : i32
      %47 = arith.remsi %arg0, %46 : i32
      %c0_i32_25 = arith.constant 0 : i32
      %48 = arith.cmpi ne, %47, %c0_i32_25 : i32
      %c0_i32_26 = arith.constant 0 : i32
      %49 = arith.cmpi slt, %47, %c0_i32_26 : i32
      %c0_i32_27 = arith.constant 0 : i32
      %50 = arith.cmpi slt, %46, %c0_i32_27 : i32
      %51 = arith.xori %49, %50 : i1
      %52 = arith.andi %51, %48 : i1
      %53 = arith.addi %47, %46 : i32
      %54 = arith.select %52, %53, %47 : i32
      %c8_i32 = arith.constant 8 : i32
      %55 = arith.muli %54, %c8_i32 : i32
      %56 = vector.broadcast %55 : i32 to vector<8x1xi32>
      %57 = arith.addi %56, %44 : vector<8x1xi32>
      %c4_i32 = arith.constant 4 : i32
      %58 = vector.broadcast %c4_i32 : i32 to vector<8x1xi32>
      %59 = arith.cmpi slt, %57, %58 : vector<8x1xi32>
      %cst_28 = arith.constant 0.000000e+00 : f32
      %60 = vector.broadcast %cst_28 : f32 to vector<8x1xf32>
      %61 = arith.select %59, %43, %60 : vector<8x1xi1>, vector<8x1xf32>
      %62 = vector.shape_cast %61 : vector<8x1xf32> to vector<1x8x1xf32>
      %cst_29 = arith.constant dense<0.000000e+00> : vector<1xf32>
      %63 = vector.multi_reduction <add>, %62, %cst_29 [1, 2] : vector<1x8x1xf32> to vector<1xf32>
      %64 = vector.shape_cast %63 : vector<1xf32> to vector<1x1x1xf32>
      %65 = vector.extract %64[0, 0, 0] : f32 from vector<1x1x1xf32>
      %66 = vector.broadcast %65 : f32 to vector<1x8x128xf32>
      %c0_30 = arith.constant 0 : index
      %c0_31 = arith.constant 0 : index
      %c0_32 = arith.constant 0 : index
      %67 = vector.load %arg5[%c0_30, %c0_31, %c0_32] : memref<1x8x128xf32, #tpu.memory_space<vmem>>, vector<1x8x128xf32>
      tpu.vector_store %arg5[%c0_30, %c0_31, %c0_32], %66 {strides = array<i32>} : memref<1x8x128xf32, #tpu.memory_space<vmem>>, vector<1x8x128xf32>,
    } else {
    }
    return
  }
  func.func @transform_0(%arg0: i32, %arg1: i32) -> (i32, i32) {
    %c0_i32 = arith.constant 0 : i32
    %c0_i32_0 = arith.constant 0 : i32
    return %arg0, %c0_i32 : i32, i32
  }
  func.func @transform_1(%arg0: i32, %arg1: i32) -> (i32, i32) {
    %c1_i32 = arith.constant 1 : i32
    %0 = arith.addi %arg0, %c1_i32 : i32
    %c2_i32 = arith.constant 2 : i32
    %c0_i32 = arith.constant 0 : i32
    %1 = arith.cmpi eq, %c2_i32, %c0_i32 : i32
    %c1_i32_0 = arith.constant 1 : i32
    %2 = arith.select %1, %c1_i32_0, %c2_i32 : i32
    %3 = arith.remsi %0, %2 : i32
    %c0_i32_1 = arith.constant 0 : i32
    %4 = arith.cmpi ne, %3, %c0_i32_1 : i32
    %c0_i32_2 = arith.constant 0 : i32
    %5 = arith.cmpi slt, %3, %c0_i32_2 : i32
    %c0_i32_3 = arith.constant 0 : i32
    %6 = arith.cmpi slt, %2, %c0_i32_3 : i32
    %7 = arith.xori %5, %6 : i1
    %8 = arith.andi %7, %4 : i1
    %9 = arith.addi %3, %2 : i32
    %10 = arith.select %8, %9, %3 : i32
    %c0_i32_4 = arith.constant 0 : i32
    %c0_i32_5 = arith.constant 0 : i32
    return %10, %c0_i32_4 : i32, i32
  }
  func.func @transform_2(%arg0: i32, %arg1: i32) -> (i32, i32) {
    %c0_i32 = arith.constant 0 : i32
    %c0_i32_0 = arith.constant 0 : i32
    return %arg1, %c0_i32 : i32, i32
  }
  func.func @transform_3(%arg0: i32, %arg1: i32) -> (i32, i32, i32) {
    %c0_i32 = arith.constant 0 : i32
    %c0_i32_0 = arith.constant 0 : i32
    %c0_i32_1 = arith.constant 0 : i32
    return %arg0, %c0_i32, %c0_i32_0 : i32, i32, i32
  }
}

</mosaic_0001>

<bundles_post_ra>
// kernel: tpu_custom_call.1
= control target key start
LH: loop header
LB: loop body
LE: loop exit
PB: predicated region body
PF: predicated region fallthrough
CT: control target
= control target key end

     0   :  { %s1363_s0 = inlined_call_operand.hbm [shape: f32[16,128], index: 0, kind: input, shape index: {}]   ;;  %s1364_s1 = inlined_call_operand.hbm [shape: f32[16,128], index: 1, kind: input, shape index: {}]   ;;  %s1365_s2 = inlined_call_operand.hbm [shape: f32[16,128], index: 2, kind: input, shape index: {}]   ;;  %s1366_s3 = inlined_call_operand.hbm [shape: f32[2,8,128], index: 3, kind: output, shape index: {}]  }
   0x1   :  { %1374 = sst [smem:[#allocation16_spill]] %s1363_s0 }
   0x2   :  { %1375 = sst [smem:[#allocation17_spill]] %s1365_s2 }
   0x3   :  { %8 = vsyncpa [#allocation5], 0 }
   0x4   :  { %10 = vsyncpa [#allocation5 + $0x1], 0 }
   0x5   :  { %11 = vsyncpa [#allocation8], 0 }
   0x6   :  { %13 = vsyncpa [#allocation8 + $0x1], 0 }
   0x7   :  { %14 = vsyncpa [#allocation6], 0 }
   0x8   :  { %16 = vsyncpa [#allocation6 + $0x1], 0  ;;  %s1011_s12 = smov 0   ;;  %s1013_s13 = smov 0  }
   0x9   :  { %s1015_s14 = smov 0   ;;  %s1017_s15 = smov 0  }
   0xa   :  { %s1019_s16 = smov 0   ;;  %s1021_s17 = smov 0  }
   0xb   :  { %s1023_s18 = smov 0   ;;  %s1025_s19 = smov 0  }
   0xc   :  { %s1027_s20 = smov 0  }
   0xd LB: > { %s1057_s21 = sadd.s32 4294967295, %s980_s20   ;;  %p617_p0 = scmp.ge.s32.totalorder %s980_s20, 1  ;;  %s980_s20 = sphi %s1027_s20, %s22_s20   ;;  %s976_s19 = sphi %s1025_s19, %s1408_s19   ;;  %s972_s18 = sphi %s1023_s18, %s1407_s18   ;;  %s968_s17 = sphi %s1021_s17, %s1406_s17   ;;  %s964_s16 = sphi %s1019_s16, %s1405_s16   ;;  %s960_s15 = sphi %s1017_s15, %s1404_s15   ;;  %s956_s14 = sphi %s1015_s14, %s1403_s14   ;;  %s952_s13 = sphi %s1013_s13, %s1402_s13   ;;  %s948_s12 = sphi %s1011_s12, %s1401_s12  }
   0xe   : > { %p1367_p1 = scmp.eq.s32.totalorder %s1057_s21, 0  ;;  %p169_p2 = scmp.lt.s32.totalorder %s980_s20, 3 }
   0xf   : > { %s982_s23 = smov [#allocation9]   ;;  %s1378_s2 = sld [smem:[#allocation17_spill]] }
  0x10   : > { %p1062_p3 = pnand %p617_p0, %p169_p2  ;;  %s184_s24 = sshll.u32 %s982_s23, 4  ;;  %s185_s24 = int_to_ptr.vmem [resolvable:$true] %s184_s24 }
  0x12   : > { %s1376_s22 = scalar_select %p1062_p3, 1, 0 }
  0x13   : > { %p661_p4 = pneg %p1062_p3 }
  0x15   : > { %p1071_p6 = pnand %p661_p4, %p1367_p1  ;;  %s778_s28 = scalar_lea.hbm %s1378_s2, 256 }
  0x16   : > { %p779_p7 = scmp.ne.s32.totalorder %s1378_s2, %s778_s28  ;;  %p785_p11 = scmp.lt.u32.totalorder %s778_s28, %s1378_s2 }
  0x17   : > { %p780_p8 = pneg %p1071_p6 }
  0x19   : > { %p781_p9 = pnand %p780_p8, %p779_p7 }
  0x1b   : > { %p782_p10 = pneg %p781_p9 }
  0x1d   : > { %p787_p12 = pnand %p785_p11, %p782_p10 }
  0x1f   : > { %790 = shalt.err (!%p787_p12)
}
  0x20   : > { %s791_s6 = scalar_lea.vmem %s185_s24, 256  ;;  %p799_p4 = scmp.lt.s32.totalorder %s185_s24, %s185_s24 }
  0x21   : > { %p792_p13 = scmp.ne.s32.totalorder %s185_s24, %s791_s6  ;;  %p800_p5 = scmp.lt.s32.totalorder %s791_s6, %s791_s6 }
  0x23   : > { %p794_p0 = pnand %p792_p13, %p780_p8  ;;  %p801_p1 = por %p800_p5, %p799_p4 }
  0x25   : > { %p795_p2 = pneg %p794_p0 }
  0x27   : > { %p802_p3 = pnand %p801_p1, %p795_p2 }
  0x29   : > { %805 = shalt.err (!%p802_p3)
}
  0x2a   : > { %s983_s7 = smov 128   ;;  %s984_s8 = smov 8  }
  0x2b   : > { %664 = dma.hbm_to_vmem [thread:$0]  (!%p1071_p6), %s1378_s2, 256, %s185_s24, [#allocation8], %s983_s7, %s983_s7, %s984_s8  }
  0x2c   : > { %s610_s11 = sadd.s32 4294967294, %s980_s20   ;;  %s34_s23 = sadd.s32 1, %s976_s19 }
  0x2d   : > { %s41_s26 = sadd.s32 1, %s968_s17  ;;  %p36_p1 = scmp.ge.s32.totalorder %s34_s23, 2 }
  0x2e   : > { %p48_p3 = scmp.ne.s32.totalorder %s968_s17, %s964_s16  ;;  %p1371_p5 = scmp.eq.s32.totalorder %s980_s20, 0 }
  0x2f   : > { %p54_p7 = scmp.ne.s32.totalorder %s964_s16, %s960_s15  ;;  %p1381_p8 = scmp.eq.s32.totalorder %s1057_s21, 0 }
  0x30   : > { %s1099_s27 = scalar_select %p36_p1, 0, %s34_s23  }
  0x31   : > { %p1106_p6 = por %p1371_p5, %p48_p3  ;;  %p1115_p9 = por %p1381_p8, %p54_p7 }
  0x32   : > { %1379 = sst [smem:[#allocation15_spill]] %s1099_s27  ;;  %s38_s28 = ssub.s32 %s976_s19, %s1099_s27 }
  0x33   : > { %p39_p10 = scmp.eq.s32.totalorder %s38_s28, 0  ;;  %s66_s29 = ssub.s32 0, %s34_s23 }
  0x34   : > { %s1121_s30 = smin.u32 %s66_s29, %s34_s23  ;;  %s77_s4 = sadd.s32 1, %s1099_s27 }
  0x35   : > { %s1125_s5 = scalar_select %p39_p10, %s968_s17, %s41_s26  }
  0x36   : > { %s79_s6 = ssub.s32 0, %s77_s4  ;;  %p156_p11 = scmp.eq.s32.totalorder %s1057_s21, 1 }
  0x37   : > { %s614_s7 = smin.u32 %s79_s6, %s77_s4  ;;  %p162_p12 = scmp.eq.s32.totalorder %s610_s11, 1 }
  0x38   : > { %s1128_s8 = sand.u32 1, %s614_s7   ;;  %p1133_p13 = por %p156_p11, %p48_p3 }
  0x39   : > { %p1140_p0 = por %p162_p12, %p54_p7  ;;  %p1370_p2 = scmp.lt.s32.totalorder %s980_s20, 2 }
  0x3a   : > { %s1383_s9 = scalar_select %p1133_p13, 1, 0 }
  0x3b   : > { %s1384_s10 = scalar_select %p1140_p0, 1, 0 }
  0x3c   : > { %s198_s23 = sand.u32 1, %s968_s17   ;;  %s621_s26 = sshll.u32 %s976_s19, 7 }
  0x3d   : > { %s620_s28 = sshll.u32 %s198_s23, 3  ;;  %s1385_s0 = sld [smem:[#allocation16_spill]] }
  0x3e   : > { %s202_s11 = scalar_lea.vmem [#allocation4], %s620_s28  ;;  %p1156_p4 = pnand %p1370_p2, %p1106_p6 }
  0x3f   : > { %s209_s7 = sshll.u32 %s202_s11, 4  ;;  %s199_s27 = scalar_lea.sflag [#allocation5], %s198_s23  ;;  %s1160_s7 = int_to_ptr.vmem [resolvable:$true] %s209_s7 }
  0x40   : > { %p808_p3 = pneg %p1156_p4 }
  0x43   : > { %s1150_s6 = scalar_lea.hbm %s1385_s0, %s621_s26  ;;  %s811_s28 = scalar_lea.hbm %s1385_s0, 256 }
  0x44   : > { %s806_s29 = scalar_lea.hbm %s1150_s6, 128  ;;  %p812_p6 = scmp.lt.u32.totalorder %s1150_s6, %s1385_s0 }
  0x45   : > { %p807_p1 = scmp.ne.s32.totalorder %s1150_s6, %s806_s29  ;;  %p813_p10 = scmp.lt.u32.totalorder %s811_s28, %s806_s29 }
  0x46   : > { %p815_p12 = scmp.lt.u32.totalorder %s806_s29, %s1150_s6 }
  0x47   : > { %p809_p7 = pnand %p808_p3, %p807_p1  ;;  %p814_p11 = por %p813_p10, %p812_p6 }
  0x49   : > { %p810_p8 = pneg %p809_p7  ;;  %p816_p2 = por %p815_p12, %p814_p11 }
  0x4b   : > { %p817_p5 = pnand %p816_p2, %p810_p8 }
  0x4d   : > { %820 = shalt.err (!%p817_p5)
}
  0x4e   : > { %s821_s23 = scalar_lea.vmem %s1160_s7, 128  ;;  %s985_s26 = smov [#allocation4]  }
  0x4f   : > { %p822_p1 = scmp.ne.s32.totalorder %s1160_s7, %s821_s23  ;;  %s826_s24 = sshll.u32 %s985_s26, 4  ;;  %s827_s24 = int_to_ptr.vmem [resolvable:$false] %s826_s24 }
  0x50   : > { %s828_s4 = scalar_lea.vmem %s827_s24, 256  ;;  %p829_p13 = scmp.lt.s32.totalorder %s1160_s7, %s827_s24 }
  0x51   : > { %p824_p7 = pnand %p822_p1, %p808_p3  ;;  %p830_p6 = scmp.lt.s32.totalorder %s828_s4, %s821_s23 }
  0x53   : > { %p825_p0 = pneg %p824_p7  ;;  %p831_p10 = por %p830_p6, %p829_p13 }
  0x55   : > { %p832_p11 = pnand %p831_p10, %p825_p0 }
  0x57   : > { %835 = shalt.err (!%p832_p11)
}
  0x58   : > { %668 = dma.hbm_to_vmem [thread:$0]  (!%p1156_p4), %s1150_s6, 128, %s1160_s7, %s199_s27  }
  0x59   : > { %s68_s29 = sand.u32 1, %s1121_s30   ;;  %s93_s28 = sadd.s32 1, %s956_s14 }
  0x5a   : > { %p100_p5 = scmp.ne.s32.totalorder %s956_s14, %s952_s13  ;;  %p613_p13 = scmp.lt.s32.totalorder %s68_s29, 0 }
  0x5b   : > { %s75_s2 = sadd.s32 2, %s68_s29  ;;  %p616_p0 = scmp.lt.s32.totalorder %s1128_s8, 0 }
  0x5c   : > { %s88_s11 = sadd.s32 2, %s1128_s8  ;;  %s1410_s2 = smov (!%p613_p13, %s75_s2), %s68_s29 }
  0x5d   : > { %s1412_s11 = smov (!%p616_p0, %s88_s11), %s1128_s8  ;;  %p1387_p2 = scmp.eq.s32.totalorder %s980_s20, 0 }
  0x5e   : > { %p106_p8 = scmp.ne.s32.totalorder %s952_s13, %s948_s12  ;;  %s90_s27 = ssub.s32 %s1410_s2, %s1412_s11 }
  0x5f   : > { %p1196_p3 = por %p100_p5, %p1387_p2  ;;  %s216_s6 = sand.u32 1, %s980_s20  }
  0x60   : > { %p91_p4 = scmp.eq.s32.totalorder %s90_s27, 0  ;;  %p1389_p12 = scmp.eq.s32.totalorder %s1057_s21, 0 }
  0x61   : > { %s218_s7 = sand.u32 1, %s956_s14   ;;  %s626_s8 = sshll.u32 %s1410_s2, 7 }
  0x62   : > { %p1205_p1 = por %p106_p8, %p1389_p12  ;;  %s622_s24 = sshll.u32 %s218_s7, 3 }
  0x63   : > { %s1211_s26 = scalar_select %p91_p4, %s956_s14, %s93_s28  }
  0x64   : > { %s1390_s30 = scalar_select %p1205_p1, 1, 0 }
  0x65   : > { %s1216_s0 = scalar_lea.hbm %s1364_s1, %s626_s8  ;;  %s220_s12 = scalar_lea.vmem [#allocation7], %s622_s24 }
  0x66   : > { %s240_s11 = sshll.u32 %s220_s12, 4  ;;  %p1391_p7 = scmp.lt.s32.totalorder %s980_s20, 2  ;;  %s1226_s11 = int_to_ptr.vmem [resolvable:$true] %s240_s11 }
  0x67   : > { %s217_s28 = scalar_lea.sflag [#allocation8], %s216_s6  ;;  %s836_s2 = scalar_lea.hbm %s1216_s0, 128 }
  0x68   : > { %p1222_p6 = pnand %p1391_p7, %p1196_p3  ;;  %p837_p10 = scmp.ne.s32.totalorder %s1216_s0, %s836_s2 }
  0x69   : > { %s841_s24 = scalar_lea.hbm %s1364_s1, 256  ;;  %p842_p0 = scmp.lt.u32.totalorder %s1216_s0, %s1364_s1 }
  0x6a   : > { %p838_p11 = pneg %p1222_p6  ;;  %p843_p2 = scmp.lt.u32.totalorder %s841_s24, %s836_s2 }
  0x6b   : > { %p845_p8 = scmp.lt.u32.totalorder %s836_s2, %s1216_s0 }
  0x6c   : > { %p839_p5 = pnand %p838_p11, %p837_p10  ;;  %p844_p3 = por %p843_p2, %p842_p0 }
  0x6e   : > { %p840_p13 = pneg %p839_p5  ;;  %p846_p4 = por %p845_p8, %p844_p3 }
  0x70   : > { %p847_p12 = pnand %p846_p4, %p840_p13 }
  0x72   : > { %850 = shalt.err (!%p847_p12)
}
  0x73   : > { %s851_s6 = scalar_lea.vmem %s1226_s11, 128  ;;  %s986_s29 = smov [#allocation7]  }
  0x74   : > { %p852_p7 = scmp.ne.s32.totalorder %s1226_s11, %s851_s6  ;;  %s856_s12 = sshll.u32 %s986_s29, 4  ;;  %s857_s12 = int_to_ptr.vmem [resolvable:$false] %s856_s12 }
  0x75   : > { %s858_s7 = scalar_lea.vmem %s857_s12, 256  ;;  %p859_p1 = scmp.lt.s32.totalorder %s1226_s11, %s857_s12 }
  0x76   : > { %p854_p10 = pnand %p852_p7, %p838_p11  ;;  %p860_p0 = scmp.lt.s32.totalorder %s858_s7, %s851_s6 }
  0x78   : > { %p855_p5 = pneg %p854_p10  ;;  %p861_p2 = por %p860_p0, %p859_p1 }
  0x7a   : > { %p862_p3 = pnand %p861_p2, %p855_p5 }
  0x7c   : > { %865 = shalt.err (!%p862_p3)
}
  0x7d   : > { %671 = dma.hbm_to_vmem [thread:$0]  (!%p1222_p6), %s1216_s0, 128, %s1226_s11, %s217_s28  }
  0x7e   : > { %p1393_p13 = scmp.ne.s32.totalorder %s1376_s22, 0 }
  0x7f   : > { %s1256_s2 = sand.u32 (!%p1393_p13), 1, %s964_s16  }
  0x80   : > { %249 = sbr.rel (%p1393_p13) target bundleno = 950 (0x3b6), region = 32  ;;  %s628_s23 = sshll.u32 (!%p1393_p13), %s1256_s2, 3 }
  0x81   : > { %s252_s24 = scalar_lea.sflag (!%p1393_p13), [#allocation5], %s1256_s2  ;;  %s255_s8 = scalar_lea.vmem (!%p1393_p13), [#allocation4], %s628_s23 }
  0x87   : > { %931 = dma.done.wait (%p1115_p9), %s252_s24, 128  }
  0x88   : > { %933 = vsyncadd (%p1115_p9), %s252_s24, 4294967168  ;;  %s260_s0 = sand.u32 1, %s1057_s21   ;;  %s262_s22 = sand.u32 1, %s952_s13  }
  0x89   : > { %s629_s11 = sshll.u32 %s262_s22, 3  ;;  %s261_s27 = scalar_lea.sflag [#allocation8], %s260_s0 }
  0x8a   : > { %s264_s28 = scalar_lea.vmem [#allocation7], %s629_s11  ;;  %p1394_p1 = scmp.ne.s32.totalorder %s1390_s30, 0 }
  0x8c   : > { %935 = dma.done.wait (%p1394_p1), %s261_s27, 128  }
  0x8d   : > { %937 = vsyncadd (%p1394_p1), %s261_s27, 4294967168  ;;  %p1395_p6 = scmp.eq.s32.totalorder %s1057_s21, 0 }
  0x8f   : > { %939 = dma.done.wait (%p1395_p6), [#allocation8], 256   ;;  %p1396_p11 = pmov %p1395_p6 }
  0x90   : > { %v1276_v0 = vld [vmem:[#allocation9] sm:$0xff]  ;;  %v1280_v2 = vld [vmem:[#allocation9 + $0x8] sm:$0xff]  ;;  %v1286_v5 = vld [vmem:[%s264_s28] sm:$0xff]  ;;  %v987_v8 = vmov 0.0|0.0   ;;  %vm314_vm0 = vcmask 7168   ;;  %v988_v9 = vmov 0.0   ;;  %v467_v59 = vlaneseq }
  0x91   : > { %941 = vsyncadd (%p1396_p11), [#allocation8], 4294967040  ;;  %v1278_v1 = vld [vmem:[%s255_s8] sm:$0xff]  ;;  %v334_v3 = vmul.f32 %v1276_v0, %v1276_v0  ;;  %v335_v6 = vmul.f32 %v1280_v2, %v1280_v2  ;;  %v445_v7 = vmul.f32 %v1286_v5, %v1286_v5  ;;  %646 = vmatprep.subr.bf16.mxu0 %v987_v8  ;;  %315 = vst.msk [vmem:[#allocation2] sm:$0xff] %vm314_vm0, %v988_v9  ;;  %vm989_vm1 = vmmov 0   ;;  %s295_s21 = scalar_lea.vmem [#allocation10], %s628_s23 }
  0x92   : > { %v317_v4 = vmul.f32 %v1278_v1, %v1278_v1  ;;  %643 = vmatprep.mubr.msk.f32.mxu0 %vm989_vm1, %v988_v9  ;;  %vm434_vm10 = vcmask 130048   ;;  %v468_v61 = vshrl.u32 %v467_v59, 7  ;;  %s497_s25 = sshll.u32 %s295_s21, 4  ;;  %s633_s30 = sshll.u32 %s972_s18, 7  ;;  %s1302_s25 = int_to_ptr.vmem [resolvable:$true] %s497_s25 }
  0x93   : > { %336 = vadd.xlane.f32.xlu0 %v334_v3  ;;  %s1307_s12 = scalar_lea.hbm %s1366_s3, %s633_s30  ;;  %s484_s7 = scalar_lea.sflag [#allocation6], %s1256_s2 }
  0x94   : > { %318 = vadd.xlane.f32.xlu1 %v317_v4  ;;  %vm469_vm11 = vcmp.lt.s32.totalorder %v468_v61, 4  ;;  %s866_s24 = scalar_lea.vmem %s1302_s25, 128  ;;  %p1397_p8 = scmp.ne.s32.totalorder %s1383_s9, 0 }
  0x95   : > { %p867_p9 = scmp.ne.s32.totalorder %s1302_s25, %s866_s24  ;;  %s990_s18 = smov [#allocation10]  }
  0x96   : > { %s870_s23 = sshll.u32 %s990_s18, 4  ;;  %s871_s23 = int_to_ptr.vmem [resolvable:$false] %s870_s23 }
  0x97   : > { %338 = vadd.xlane.f32.xlu0 %v335_v6  ;;  %p868_p4 = pnand %p867_p9, %p1397_p8  ;;  %s872_s8 = scalar_lea.vmem %s871_s23, 256 }
  0x98   : > { %446 = vadd.xlane.f32.xlu1 %v445_v7  ;;  %v430_v54 = vld [vmem:[#allocation2] sm:$0xff]  ;;  %p873_p7 = scmp.lt.s32.totalorder %s1302_s25, %s871_s23  ;;  %p874_p10 = scmp.lt.s32.totalorder %s872_s8, %s866_s24 }
  0x99   : > { %p869_p12 = pneg %p868_p4 }
  0x9a   : > { %p875_p5 = por %p874_p10, %p873_p7 }
  0x9c   : > { %p876_p0 = pnand %p875_p5, %p869_p12 }
 0x120   : > { %v337_v10 = vpop.xlane.xlu0 %336 }
 0x121   : > { %v319_v11 = vpop.xlane.xlu1 %318  ;;  %758 = vrsqrt.f32 %v337_v10  ;;  %vm342_vm3 = vcmp.eq.f32.partialorder %v337_v10, inf  ;;  %v345_v18 = vand.u32 2147483648, %v337_v10  ;;  %vm344_vm5 = vcmp.eq.f32.partialorder %v337_v10, 0.0 }
 0x122   : > { %760 = vrsqrt.f32 %v319_v11  ;;  %vm322_vm2 = vcmp.eq.f32.partialorder %v319_v11, inf  ;;  %v325_v17 = vand.u32 2147483648, %v319_v11  ;;  %vm324_vm4 = vcmp.eq.f32.partialorder %v319_v11, 0.0 }
 0x124   : > { %v339_v12 = vpop.xlane.xlu0 %338 }
 0x125   : > { %v447_v13 = vpop.xlane.xlu1 %446  ;;  %762 = vrsqrt.f32 %v339_v12  ;;  %vm349_vm6 = vcmp.eq.f32.partialorder %v339_v12, inf  ;;  %v352_v30 = vand.u32 2147483648, %v339_v12  ;;  %vm351_vm9 = vcmp.eq.f32.partialorder %v339_v12, 0.0 }
 0x126   : > { %764 = vrsqrt.f32 %v447_v13  ;;  %vm450_vm7 = vcmp.eq.f32.partialorder %v447_v13, inf  ;;  %v453_v28 = vand.u32 2147483648, %v447_v13  ;;  %vm452_vm8 = vcmp.eq.f32.partialorder %v447_v13, 0.0 }
 0x12b   : > { %v759_v14 = vpop.eup %758 }
 0x12c   : > { %v761_v15 = vpop.eup %760  ;;  %v341_v16 = vmul.f32 %v759_v14, %v337_v10 }
 0x12d   : > { %v321_v19 = vmul.f32 %v761_v15, %v319_v11 }
 0x12e   : > { %v343_v20 = vsel %vm342_vm3, %v337_v10, %v341_v16 }
 0x12f   : > { %v763_v21 = vpop.eup %762  ;;  %v346_v22 = vsel %vm344_vm5, %v345_v18, %v343_v20  ;;  %v323_v23 = vsel %vm322_vm2, %v319_v11, %v321_v19 }
 0x130   : > { %v765_v24 = vpop.eup %764  ;;  %v354_v25 = vmax.f32 %v346_v22, 1e-12  ;;  %v326_v26 = vsel %vm324_vm4, %v325_v17, %v323_v23  ;;  %v348_v27 = vmul.f32 %v763_v21, %v339_v12 }
 0x131   : > { %v327_v29 = vmax.f32 %v326_v26, 1e-12  ;;  %v449_v31 = vmul.f32 %v765_v24, %v447_v13 }
 0x132   : > { %v350_v32 = vsel %vm349_vm6, %v339_v12, %v348_v27  ;;  %766 = vrcp.f32 %v354_v25 }
 0x133   : > { %v353_v33 = vsel %vm351_vm9, %v352_v30, %v350_v32  ;;  %v451_v34 = vsel %vm450_vm7, %v447_v13, %v449_v31  ;;  %768 = vrcp.f32 %v327_v29 }
 0x134   : > { %v355_v35 = vmax.f32 %v353_v33, 1e-12  ;;  %v454_v36 = vsel %vm452_vm8, %v453_v28, %v451_v34 }
 0x135   : > { %v455_v37 = vmax.f32 %v454_v36, 1e-12 }
 0x136   : > { %770 = vrcp.f32 %v355_v35 }
 0x137   : > { %772 = vrcp.f32 %v455_v37 }
 0x13c   : > { %v767_v38 = vpop.eup %766 }
 0x13d   : > { %v769_v39 = vpop.eup %768  ;;  %v357_v42 = vmul.f32 %v767_v38, %v1276_v0 }
 0x13e   : > { %v329_v44 = vmul.f32 %v769_v39, %v1278_v1 }
 0x140   : > { %v771_v40 = vpop.eup %770 }
 0x141   : > { %v773_v41 = vpop.eup %772  ;;  %v359_v43 = vmul.f32 %v771_v40, %v1280_v2 }
 0x142   : > { %v457_v45 = vmul.f32 %v773_v41, %v1286_v5 }
 0x143   : > { %v647_v46 = vpack.c.bf16 %v359_v43, %v357_v42 }
 0x144   : > { %v458_v47 = vmul.f32 %v457_v45, %v329_v44 }
 0x145   : > { %648 = vmatpush3.bf16.xpose.msra.mxu0 %v647_v46 }
 0x146   : > { %459 = vadd.xlane.f32.xlu1 %v458_v47 }
 0x14c   : > { %644 = vmatmul.mubr.f32.vlgmr.msra.gmra.mrb[0].mxu0 %v329_v44 }
 0x1d3   : > { %v460_v60 = vpop.xlane.xlu1 %459 }
 0x1d4   : > { %v465_v63 = vmul.f32 2.0, %v460_v60 }
 0x21f   : > { %v426_v48 = vpop.f32.mrb[0].mxu0 }
 0x220   : > { %v431_v49 = vmul.f32 2.0, %v426_v48  ;;  %v645_v50 = vpop.f32.mrb[1].mxu0 }
 0x222   : > { %v432_v51 = vmul.f32 1.442695, %v431_v49 }
 0x224   : > { %774 = vpow2.f32 %v432_v51 }
 0x22e   : > { %v775_v52 = vpop.eup %774 }
 0x22f   : > { %v435_v53 = vsel %vm434_vm10, %v775_v52, 0.0 }
 0x230   : > { %436 = vadd.xlane.f32.xlu0 %v435_v53 }
 0x2bd   : > { %v437_v55 = vpop.xlane.xlu0 %436 }
 0x2be   : > { %v438_v56 = vadd.f32 %v437_v55, %v430_v54 }
 0x2c0   : > { %440 = vst.msk [vmem:[#allocation2] sm:$0xff] %vm314_vm0, %v438_v56 }
 0x2c7   : > { %v461_v57 = vld [vmem:[#allocation2] sm:$0xff] }
 0x2c8   : > { %v462_v58 = vadd.f32 -14.389056, %v461_v57 }
 0x2ca   : > { %776 = vlog2.f32 %v462_v58 }
 0x2d4   : > { %v777_v62 = vpop.eup %776 }
 0x2d5   : > { %v464_v0 = vmul.f32 0.6931472, %v777_v62 }
 0x2d7   : > { %v466_v1 = vsub.f32 %v464_v0, %v465_v63 }
 0x2d9   : > { %v470_v2 = vsel %vm469_vm11, %v466_v1, 0.0 }
 0x2da   : > { %v471_v3 = vsel %vm314_vm0, %v470_v2, 0.0 }
 0x2db   : > { %472 = vadd.xlane.f32.xlu0 %v471_v3 }
 0x368   : > { %v473_v4 = vpop.xlane.xlu0 %472 }
 0x369   : > { %v474_v5 = vrot.slane %v473_v4, 4 }
 0x36b   : > { %v475_v6 = vadd.f32 %v474_v5, %v473_v4 }
 0x36d   : > { %v476_v7 = vrot.slane %v475_v6, 2 }
 0x36f   : > { %v477_v8 = vadd.f32 %v476_v7, %v475_v6 }
 0x371   : > { %v478_v9 = vrot.slane %v477_v8, 1 }
 0x373   : > { %v479_v10 = vadd.f32 %v478_v9, %v477_v8 }
 0x375   : > { %649 = vpush %v479_v10 }
 0x3a6   : > { %s650_s4 = spop %649 }
 0x3a7   : > { %v481_v11 = vstv %s650_s4 }
 0x3a8   : > { %482 = vst [vmem:[%s295_s21] sm:$0xff] %v481_v11 }
 0x3a9   : > { %879 = shalt.err (!%p876_p0)
}
 0x3aa   : > { %s880_s2 = scalar_lea.hbm %s1307_s12, 128  ;;  %s884_s11 = scalar_lea.hbm %s1366_s3, 256 }
 0x3ab   : > { %p881_p2 = scmp.ne.s32.totalorder %s1307_s12, %s880_s2  ;;  %p885_p1 = scmp.lt.u32.totalorder %s1307_s12, %s1366_s3 }
 0x3ac   : > { %p886_p6 = scmp.lt.u32.totalorder %s884_s11, %s880_s2  ;;  %p888_p9 = scmp.lt.u32.totalorder %s880_s2, %s1307_s12 }
 0x3ad   : > { %p882_p3 = pnand %p881_p2, %p1397_p8 }
 0x3ae   : > { %p887_p11 = por %p886_p6, %p885_p1 }
 0x3af   : > { %p883_p13 = pneg %p882_p3 }
 0x3b0   : > { %p889_p4 = por %p888_p9, %p887_p11 }
 0x3b2   : > { %p890_p12 = pnand %p889_p4, %p883_p13 }
 0x3b4   : > { %893 = shalt.err (!%p890_p12)
}
 0x3b5   : > { %659 = dma.vmem_to_hbm [thread:$0]  (%p1397_p8), %s1302_s25, 128, %s1307_s12, %s484_s7  }
 0x3b6 PF: > { %s509_s21 = sand.u32 1, %s960_s15   ;;  %p1398_p7 = scmp.ne.s32.totalorder %s1384_s10, 0 }
 0x3b7   : > { %p1399_p10 = scmp.ge.s32.totalorder %s980_s20, 2  ;;  %s510_s30 = scalar_lea.sflag [#allocation6], %s509_s21 }
 0x3b9   : > { %p673_p5 = pnand %p1399_p10, %p1398_p7 }
 0x3bb   : > { %943 = dma.done.wait (!%p673_p5), %s510_s30, 128  }
 0x3bc   : > { %945 = vsyncadd (!%p673_p5), %s510_s30, 4294967168  ;;  %s22_s20 = sadd.s32 1, %s980_s20   ;;  %s1400_s9 = sld [smem:[#allocation15_spill]] }
 0x3bd   : > { %p19_p0 = scmp.ge.s32.totalorder %s22_s20, 4   ;;  %s1401_s12 = smov %s952_s13 }
 0x3be   : > { %s1402_s13 = smov %s956_s14  ;;  %s1403_s14 = smov %s1211_s26 }
 0x3bf   : > { %s1404_s15 = smov %s964_s16  ;;  %s1405_s16 = smov %s968_s17 }
 0x3c0   : > { %s1406_s17 = smov %s1125_s5  ;;  %s1407_s18 = smov %s976_s19 }
 0x3c1   :  { %21 = sbr.rel (!%p19_p0) target bundleno = 13 (0xd), region = 103 }
 0x3c2   : > { %s1408_s19 = smov %s1400_s9 }
 0x3c8   :  { %515 = vsyncpa [#allocation5], 1 }
 0x3c9   :  { %517 = vsyncpa [#allocation5 + $0x1], 1 }
 0x3ca   :  { %518 = vsyncpa [#allocation8], 1 }
 0x3cb   :  { %520 = vsyncpa [#allocation8 + $0x1], 1 }
 0x3cc   :  { %521 = vsyncpa [#allocation6], 1 }
 0x3cd   :  { %523 = vsyncpa [#allocation6 + $0x1], 1 }

</bundles_post_ra>
